<compile_context>
chip_gen: v6e
topology: v6e:2x2x1
jax: 0.10.0
libtpu: 0.0.40
codegen_flags: <defaults>
</compile_context>

<pallas_src>
import functools

import jax
import jax.numpy as jnp
from jax import lax
from jax.experimental import pallas as pl
from jax.experimental.pallas import tpu as pltpu

F32 = jnp.float32
BF16 = jnp.bfloat16
VMEM_SPEC = pl.BlockSpec(memory_space=pltpu.MemorySpace.VMEM)

LM_HEAD_TILE = 2048            # vocab tile (multiple of 256 for v6e/v7x MXU)
APPROX_SOFTMAX_RECIPROCAL = True   # EUP vrcp; set False to bit-match exact softmax


# ------------------------------ Pallas kernels ------------------------------ #

def _layernorm(x, g, b):
    mu = jnp.mean(x, axis=-1, keepdims=True)
    xc = x - mu
    var = jnp.mean(xc * xc, axis=-1, keepdims=True)
    return xc * lax.rsqrt(var + 1e-5) * g + b


def _block_kernel(n_head,
                  lens_ref,                     # scalar-prefetch SMEM [B] int32
                  x_ref,                        # [1, T, D] residual block
                  ln1g_ref, ln1b_ref, wqkv_ref, bqkv_ref, wproj_ref, bproj_ref,
                  ln2g_ref, ln2b_ref, wfc_ref, bfc_ref, wout_ref, bout_ref,
                  o_ref):
    """One full GPT-2 transformer block for one batch element (grid over B)."""
    _, T, D = x_ref.shape
    H = n_head
    hd = D // H

    b = pl.program_id(0)
    L = lens_ref[b]                               # number of real (non-pad) tokens

    x = x_ref[0]                                  # [T, D] f32 residual

    # ---- attention sub-block -------------------------------------------------
    h = _layernorm(x, ln1g_ref[...], ln1b_ref[...])
    qkv = jnp.dot(h.astype(BF16), wqkv_ref[...],
                  preferred_element_type=F32) + bqkv_ref[...]      # [T, 3D]

    # Head-batched q/k/v: static lane slices stacked along the MAJOR axis so all
    # H heads feed a single batched MXU contraction (no per-head matmul loop).
    def head_stack(col0):
        return jnp.stack(
            [qkv[:, col0 + hh * hd: col0 + (hh + 1) * hd] for hh in range(H)],
            axis=0).astype(BF16)                   # [H, T, hd]

    qh, kh, vh = head_stack(0), head_stack(D), head_stack(2 * D)

    # causal AND key-padding mask; only a [T, T] tile is ever live
    qi = lax.broadcasted_iota(jnp.int32, (T, T), 0)
    ki = lax.broadcasted_iota(jnp.int32, (T, T), 1)
    keep = (ki <= qi) & (ki < L)
    bias = jnp.where(keep, 0.0, -1e9).astype(F32)  # [T, T]

    s = jnp.einsum("hqd,hkd->hqk", qh, kh,
                   preferred_element_type=F32)     # [H, T, T], one batched matmul
    s = s * (1.0 / float(hd) ** 0.5) + bias[None, :, :]
    m = jnp.max(s, axis=-1, keepdims=True)
    p = jnp.exp(s - m)                             # f32 elementwise (v5e-safe)
    denom = jnp.sum(p, axis=-1, keepdims=True)
    if APPROX_SOFTMAX_RECIPROCAL:
        p = p * pl.reciprocal(denom, approx=True)  # EUP slot, off the VALU path
    else:
        p = p / denom
    ctx = jnp.einsum("hqk,hkd->hqd", p.astype(BF16), vh,
                     preferred_element_type=F32)   # [H, T, hd], one batched matmul
    attn = jnp.concatenate([ctx[hh] for hh in range(H)], axis=-1)   # [T, D]

    proj = jnp.dot(attn.astype(BF16), wproj_ref[...],
                   preferred_element_type=F32) + bproj_ref[...]
    x = x + proj

    # ---- MLP sub-block ---------------------------------------------------------
    h2 = _layernorm(x, ln2g_ref[...], ln2b_ref[...])
    ff = jnp.dot(h2.astype(BF16), wfc_ref[...],
                 preferred_element_type=F32) + bfc_ref[...]
    ff = jax.nn.gelu(ff, approximate=True)         # GPT-2 "gelu_new"; f32 (v5e-safe)
    ff = jnp.dot(ff.astype(BF16), wout_ref[...],   # cast to bf16 right after gelu
                 preferred_element_type=F32) + bout_ref[...]

    o_ref[0] = x + ff


def _final_ln_kernel(x_ref, g_ref, b_ref, o_ref):
    """Final layernorm of the gathered last tokens, computed exactly once."""
    o_ref[...] = _layernorm(x_ref[...], g_ref[...], b_ref[...]).astype(o_ref.dtype)


def _lm_head_kernel(h_ref, wteT_ref, o_ref):
    """Tied lm_head: plain [B, D] x [D, TV] matmul on a pre-transposed wte tile."""
    o_ref[...] = jnp.dot(h_ref[...], wteT_ref[...], preferred_element_type=F32)


# ------------------------------ Pallas wrappers ----------------------------- #

def transformer_block(x, lens, blk, n_head):
    B, T, D = x.shape
    kern = functools.partial(_block_kernel, n_head)

    def xmap(b, lens_ref):
        return (b, 0, 0)

    def wmap(b, lens_ref):
        return (0, 0)

    grid_spec = pltpu.PrefetchScalarGridSpec(
        num_scalar_prefetch=1,                 # lens -> SMEM, visible to index maps
        grid=(B,),                             # one batch element per grid step
        in_specs=[
            pl.BlockSpec((1, T, D), xmap),         # x
            pl.BlockSpec((1, D), wmap),            # ln1_g
            pl.BlockSpec((1, D), wmap),            # ln1_b
            pl.BlockSpec((D, 3 * D), wmap),        # wqkv (LoRA merged, bf16)
            pl.BlockSpec((1, 3 * D), wmap),        # bqkv
            pl.BlockSpec((D, D), wmap),            # wproj (LoRA merged, bf16)
            pl.BlockSpec((1, D), wmap),            # bproj
            pl.BlockSpec((1, D), wmap),            # ln2_g
            pl.BlockSpec((1, D), wmap),            # ln2_b
            pl.BlockSpec((D, 4 * D), wmap),        # wfc
            pl.BlockSpec((1, 4 * D), wmap),        # bfc
            pl.BlockSpec((4 * D, D), wmap),        # wout
            pl.BlockSpec((1, D), wmap),            # bout
        ],
        out_specs=pl.BlockSpec((1, T, D), xmap),
    )
    # TODO(synk): K-tile the weight BlockSpecs with pipeline_mode=pl.Buffered(2-3)
    # (or cross-call prefetch) at real sizes so weight DMA overlaps compute.
    return pl.pallas_call(
        kern,
        out_shape=jax.ShapeDtypeStruct((B, T, D), F32),
        grid_spec=grid_spec,
        compiler_params=pltpu.CompilerParams(
            dimension_semantics=("parallel",),         # shard batch over v7x's 2 TCs
            vmem_limit_bytes=48 * 1024 * 1024),        # fits v7x 64 MiB with headroom
    )(lens, x,
      blk["ln1_g"], blk["ln1_b"], blk["wqkv"], blk["bqkv"],
      blk["wproj"], blk["bproj"], blk["ln2_g"], blk["ln2_b"],
      blk["wfc"], blk["bfc"], blk["wout"], blk["bout"])


def final_layernorm(last_tok, g, b):
    Bp, D = last_tok.shape
    return pl.pallas_call(
        _final_ln_kernel,
        out_shape=jax.ShapeDtypeStruct((Bp, D), BF16),
        in_specs=[VMEM_SPEC] * 3,
        out_specs=VMEM_SPEC,
    )(last_tok, g, b)


def lm_head(h_bf16, wteT):
    Bp, D = h_bf16.shape
    _, Vp = wteT.shape
    TV = min(LM_HEAD_TILE, Vp)
    assert Vp % TV == 0          # guaranteed by the vocab padding in merge_for_inference
    return pl.pallas_call(
        _lm_head_kernel,
        out_shape=jax.ShapeDtypeStruct((Bp, Vp), F32),
        grid=(Vp // TV,),
        in_specs=[pl.BlockSpec((Bp, D), lambda j: (0, 0)),
                  pl.BlockSpec((D, TV), lambda j: (0, j))],
        out_specs=pl.BlockSpec((Bp, TV), lambda j: (0, j)),
        compiler_params=pltpu.CompilerParams(
            dimension_semantics=("parallel",)),
    )(h_bf16, wteT)


# ------------------------------- model config ------------------------------- #

CFG = dict(
    vocab=64,       # args.model_size -> synthetic tiny GPT-2
    d=32,           # args.d
    n_layer=2,
    n_head=4,
    max_pos=16,
    lora_rank=4,    # args.lora_rank
    lora_alpha=8,   # args.lora_alpha
)


def init_params(key, cfg):
    d, v, r = cfg["d"], cfg["vocab"], cfg["lora_rank"]

    def nrm(k, shape):
        return jax.random.normal(k, shape, F32) * 0.02

    keys = iter(jax.random.split(key, 8 + 12 * cfg["n_layer"]))
    params = {
        "wte": nrm(next(keys), (v, d)),
        "wpe": nrm(next(keys), (cfg["max_pos"], d)),
        "ln_f_g": jnp.ones((d,), F32),
        "ln_f_b": jnp.zeros((d,), F32),
        "blocks": [],
    }
    for _ in range(cfg["n_layer"]):
        blk = dict(
            ln1_g=jnp.ones((d,), F32), ln1_b=jnp.zeros((d,), F32),
            c_attn_w=nrm(next(keys), (d, 3 * d)), c_attn_b=jnp.zeros((3 * d,), F32),
            c_attn_la=nrm(next(keys), (d, r)), c_attn_lb=nrm(next(keys), (r, 3 * d)),
            c_proj_w=nrm(next(keys), (d, d)), c_proj_b=jnp.zeros((d,), F32),
            c_proj_la=nrm(next(keys), (d, r)), c_proj_lb=nrm(next(keys), (r, d)),
            ln2_g=jnp.ones((d,), F32), ln2_b=jnp.zeros((d,), F32),
            fc_w=nrm(next(keys), (d, 4 * d)), fc_b=jnp.zeros((4 * d,), F32),
            proj_w=nrm(next(keys), (4 * d, d)), proj_b=jnp.zeros((d,), F32),
        )
        params["blocks"].append(blk)
    # paraphrase_detection_head exists in the module but is unused in forward().
    params["head_w"] = nrm(next(keys), (d, 2))
    params["head_b"] = jnp.zeros((2,), F32)
    return params


def merge_for_inference(params, cfg):
    """Fold LoRA into the base weights once; pre-transpose/pad the lm_head weight."""
    scale = cfg["lora_alpha"] / cfg["lora_rank"]
    V, _ = params["wte"].shape

    wteT = jnp.transpose(params["wte"]).astype(BF16)          # [D, V], MXU-native
    if V > LM_HEAD_TILE:                                      # tail-safe vocab padding
        Vp = pl.cdiv(V, LM_HEAD_TILE) * LM_HEAD_TILE
        wteT = jnp.pad(wteT, ((0, 0), (0, Vp - V)))

    fast = {
        "wte": params["wte"],                 # f32 for the embedding gather
        "wteT_bf16": wteT,                    # [D, Vp] bf16 for the tied lm_head
        "wpe": params["wpe"],
        "ln_f_g": params["ln_f_g"][None, :],
        "ln_f_b": params["ln_f_b"][None, :],
        "blocks": [],
    }
    for blk in params["blocks"]:
        wqkv = blk["c_attn_w"] + scale * (blk["c_attn_la"] @ blk["c_attn_lb"])
        wproj = blk["c_proj_w"] + scale * (blk["c_proj_la"] @ blk["c_proj_lb"])
        fast["blocks"].append(dict(
            ln1_g=blk["ln1_g"][None, :], ln1_b=blk["ln1_b"][None, :],
            wqkv=wqkv.astype(BF16), bqkv=blk["c_attn_b"][None, :],
            wproj=wproj.astype(BF16), bproj=blk["c_proj_b"][None, :],
            ln2_g=blk["ln2_g"][None, :], ln2_b=blk["ln2_b"][None, :],
            wfc=blk["fc_w"].astype(BF16), bfc=blk["fc_b"][None, :],
            wout=blk["proj_w"].astype(BF16), bout=blk["proj_b"][None, :],
        ))
    return fast


# --------------------------------- forward ---------------------------------- #

def paraphrase_gpt_forward(fast, input_ids, attention_mask, n_head):
    B, T = input_ids.shape
    V = fast["wte"].shape[0]                       # static shape, not traced

    # token + position embeddings (tiny data-dependent gather: plain-JAX glue)
    x = (fast["wte"][input_ids] + fast["wpe"][:T][None, :, :]).astype(F32)

    # per-sequence real-token counts -> scalar-prefetched into SMEM by each block
    lens = jnp.sum(attention_mask, axis=1).astype(jnp.int32)       # [B]

    for blk in fast["blocks"]:
        x = transformer_block(x, lens, blk, n_head)

    # gather the last non-pad token per sequence (plain-JAX glue)
    last_tok = jnp.take_along_axis(x, (lens - 1)[:, None, None], axis=1)[:, 0, :]

    # pad batch rows to the 8-row sublane minimum so lm_head stores are unmasked
    Bp = ((B + 7) // 8) * 8
    if Bp != B:
        last_tok = jnp.pad(last_tok, ((0, Bp - B), (0, 0)))

    h = final_layernorm(last_tok, fast["ln_f_g"], fast["ln_f_b"])   # once, not per tile
    logits = lm_head(h, fast["wteT_bf16"])
    return logits[:B, :V]


# ----------------------------------- main ------------------------------------ #

if __name__ == "__main__":
    key = jax.random.PRNGKey(0)
    pkey, ikey = jax.random.split(key)

    params = init_params(pkey, CFG)
    fast = merge_for_inference(params, CFG)

    B, T = 2, 8
    input_ids = jax.random.randint(ikey, (B, T), 0, CFG["vocab"], dtype=jnp.int32)
    # batch 0: full length; batch 1: 5 real tokens + 3 trailing pads
    attention_mask = jnp.array(
        [[1, 1, 1, 1, 1, 1, 1, 1],
         [1, 1, 1, 1, 1, 0, 0, 0]], dtype=jnp.int32)

    fwd = jax.jit(lambda f, ids, m: paraphrase_gpt_forward(f, ids, m, CFG["n_head"]))
    logits = fwd(fast, input_ids, attention_mask)
    logits = jax.block_until_ready(logits)

    assert logits.shape == (B, CFG["vocab"]), logits.shape
    assert bool(jnp.all(jnp.isfinite(logits)))
    print("KERNEL_OK")
</pallas_src>

<mosaic_0001>
module attributes {stable_mosaic.version = 11 : i64} {
  func.func @_block_kernel(%arg0: i32, %arg1: memref<2xi32, #tpu.memory_space<smem>>, %arg2: memref<1x8x32xf32, #tpu.memory_space<vmem>>, %arg3: memref<1x32xf32, #tpu.memory_space<vmem>>, %arg4: memref<1x32xf32, #tpu.memory_space<vmem>>, %arg5: memref<32x96xbf16, #tpu.memory_space<vmem>>, %arg6: memref<1x96xf32, #tpu.memory_space<vmem>>, %arg7: memref<32x32xbf16, #tpu.memory_space<vmem>>, %arg8: memref<1x32xf32, #tpu.memory_space<vmem>>, %arg9: memref<1x32xf32, #tpu.memory_space<vmem>>, %arg10: memref<1x32xf32, #tpu.memory_space<vmem>>, %arg11: memref<32x128xbf16, #tpu.memory_space<vmem>>, %arg12: memref<1x128xf32, #tpu.memory_space<vmem>>, %arg13: memref<128x32xbf16, #tpu.memory_space<vmem>>, %arg14: memref<1x32xf32, #tpu.memory_space<vmem>>, %arg15: memref<1x8x32xf32, #tpu.memory_space<vmem>>) attributes {dimension_semantics = [#tpu.dimension_semantics<parallel>], iteration_bounds = array<i64: 2>, scalar_prefetch = 1 : i64, scratch_operands = 0 : i64, tpu.core_type = #tpu.core_type<tc>, window_params = [{transform_indices = @transform_0, window_bounds = array<i64: 1, 8, 32>}, {pipeline_mode = #tpu.pipeline_mode<synchronous>, transform_indices = @transform_1, window_bounds = array<i64: 1, 32>}, {pipeline_mode = #tpu.pipeline_mode<synchronous>, transform_indices = @transform_2, window_bounds = array<i64: 1, 32>}, {pipeline_mode = #tpu.pipeline_mode<synchronous>, transform_indices = @transform_3, window_bounds = array<i64: 32, 96>}, {pipeline_mode = #tpu.pipeline_mode<synchronous>, transform_indices = @transform_4, window_bounds = array<i64: 1, 96>}, {pipeline_mode = #tpu.pipeline_mode<synchronous>, transform_indices = @transform_5, window_bounds = array<i64: 32, 32>}, {pipeline_mode = #tpu.pipeline_mode<synchronous>, transform_indices = @transform_6, window_bounds = array<i64: 1, 32>}, {pipeline_mode = #tpu.pipeline_mode<synchronous>, transform_indices = @transform_7, window_bounds = array<i64: 1, 32>}, {pipeline_mode = #tpu.pipeline_mode<synchronous>, transform_indices = @transform_8, window_bounds = array<i64: 1, 32>}, {pipeline_mode = #tpu.pipeline_mode<synchronous>, transform_indices = @transform_9, window_bounds = array<i64: 32, 128>}, {pipeline_mode = #tpu.pipeline_mode<synchronous>, transform_indices = @transform_10, window_bounds = array<i64: 1, 128>}, {pipeline_mode = #tpu.pipeline_mode<synchronous>, transform_indices = @transform_11, window_bounds = array<i64: 128, 32>}, {pipeline_mode = #tpu.pipeline_mode<synchronous>, transform_indices = @transform_12, window_bounds = array<i64: 1, 32>}, {transform_indices = @transform_13, window_bounds = array<i64: 1, 8, 32>}]} {
    %0 = arith.index_cast %arg0 : i32 to index
    %1 = memref.load %arg1[%0] : memref<2xi32, #tpu.memory_space<smem>>
    %c0 = arith.constant 0 : index
    %c0_0 = arith.constant 0 : index
    %c0_1 = arith.constant 0 : index
    %2 = vector.load %arg2[%c0, %c0_0, %c0_1] : memref<1x8x32xf32, #tpu.memory_space<vmem>>, vector<1x8x32xf32>
    %3 = vector.shape_cast %2 : vector<1x8x32xf32> to vector<8x32xf32>
    %c0_2 = arith.constant 0 : index
    %c0_3 = arith.constant 0 : index
    %4 = vector.load %arg3[%c0_2, %c0_3] : memref<1x32xf32, #tpu.memory_space<vmem>>, vector<1x32xf32>
    %c0_4 = arith.constant 0 : index
    %c0_5 = arith.constant 0 : index
    %5 = vector.load %arg4[%c0_4, %c0_5] : memref<1x32xf32, #tpu.memory_space<vmem>>, vector<1x32xf32>
    %cst = arith.constant dense<0.000000e+00> : vector<8xf32>
    %6 = vector.multi_reduction <add>, %3, %cst [1] : vector<8x32xf32> to vector<8xf32>
    %7 = vector.shape_cast %6 : vector<8xf32> to vector<8x1xf32>
    %cst_6 = arith.constant 3.200000e+01 : f32
    %8 = vector.broadcast %cst_6 : f32 to vector<8x1xf32>
    %9 = arith.divf %7, %8 : vector<8x1xf32>
    %10 = vector.broadcast %9 : vector<8x1xf32> to vector<8x32xf32>
    %11 = arith.subf %3, %10 : vector<8x32xf32>
    %12 = arith.mulf %11, %11 : vector<8x32xf32>
    %cst_7 = arith.constant dense<0.000000e+00> : vector<8xf32>
    %13 = vector.multi_reduction <add>, %12, %cst_7 [1] : vector<8x32xf32> to vector<8xf32>
    %14 = vector.shape_cast %13 : vector<8xf32> to vector<8x1xf32>
    %cst_8 = arith.constant 3.200000e+01 : f32
    %15 = vector.broadcast %cst_8 : f32 to vector<8x1xf32>
    %16 = arith.divf %14, %15 : vector<8x1xf32>
    %cst_9 = arith.constant 9.99999974E-6 : f32
    %17 = vector.broadcast %cst_9 : f32 to vector<8x1xf32>
    %18 = arith.addf %16, %17 : vector<8x1xf32>
    %19 = math.rsqrt %18 : vector<8x1xf32>
    %20 = vector.broadcast %19 : vector<8x1xf32> to vector<8x32xf32>
    %21 = arith.mulf %11, %20 : vector<8x32xf32>
    %22 = vector.broadcast %4 : vector<1x32xf32> to vector<8x32xf32>
    %23 = arith.mulf %21, %22 : vector<8x32xf32>
    %24 = vector.broadcast %5 : vector<1x32xf32> to vector<8x32xf32>
    %25 = arith.addf %23, %24 : vector<8x32xf32>
    %26 = arith.truncf %25 : vector<8x32xf32> to vector<8x32xbf16>
    %c0_10 = arith.constant 0 : index
    %c0_11 = arith.constant 0 : index
    %27 = vector.load %arg5[%c0_10, %c0_11] : memref<32x96xbf16, #tpu.memory_space<vmem>>, vector<32x96xbf16>
    %cst_12 = arith.constant dense<0.000000e+00> : vector<8x96xf32>
    %28 = tpu.matmul %26, %27, %cst_12 {dimension_numbers = #tpu.dot_dimension_numbers<[1], [0], [0], [1], [0, 0, 1, 1], [], []>} : vector<8x32xbf16>, vector<32x96xbf16>, vector<8x96xf32> -> vector<8x96xf32>
    %c0_13 = arith.constant 0 : index
    %c0_14 = arith.constant 0 : index
    %29 = vector.load %arg6[%c0_13, %c0_14] : memref<1x96xf32, #tpu.memory_space<vmem>>, vector<1x96xf32>
    %30 = vector.broadcast %29 : vector<1x96xf32> to vector<8x96xf32>
    %31 = arith.addf %28, %30 : vector<8x96xf32>
    %32 = vector.extract_strided_slice %31 {offsets = [0, 0], sizes = [8, 8], strides = [1, 1]} : vector<8x96xf32> to vector<8x8xf32>
    %33 = vector.extract_strided_slice %31 {offsets = [0, 8], sizes = [8, 8], strides = [1, 1]} : vector<8x96xf32> to vector<8x8xf32>
    %34 = vector.extract_strided_slice %31 {offsets = [0, 16], sizes = [8, 8], strides = [1, 1]} : vector<8x96xf32> to vector<8x8xf32>
    %35 = vector.extract_strided_slice %31 {offsets = [0, 24], sizes = [8, 8], strides = [1, 1]} : vector<8x96xf32> to vector<8x8xf32>
    %36 = vector.shape_cast %32 : vector<8x8xf32> to vector<1x8x8xf32>
    %37 = vector.shape_cast %33 : vector<8x8xf32> to vector<1x8x8xf32>
    %38 = vector.shape_cast %34 : vector<8x8xf32> to vector<1x8x8xf32>
    %39 = vector.shape_cast %35 : vector<8x8xf32> to vector<1x8x8xf32>
    %40 = tpu.concatenate %36, %37, %38, %39 in 0 : vector<1x8x8xf32>, vector<1x8x8xf32>, vector<1x8x8xf32>, vector<1x8x8xf32> -> vector<4x8x8xf32>
    %41 = arith.truncf %40 : vector<4x8x8xf32> to vector<4x8x8xbf16>
    %42 = vector.extract_strided_slice %31 {offsets = [0, 32], sizes = [8, 8], strides = [1, 1]} : vector<8x96xf32> to vector<8x8xf32>
    %43 = vector.extract_strided_slice %31 {offsets = [0, 40], sizes = [8, 8], strides = [1, 1]} : vector<8x96xf32> to vector<8x8xf32>
    %44 = vector.extract_strided_slice %31 {offsets = [0, 48], sizes = [8, 8], strides = [1, 1]} : vector<8x96xf32> to vector<8x8xf32>
    %45 = vector.extract_strided_slice %31 {offsets = [0, 56], sizes = [8, 8], strides = [1, 1]} : vector<8x96xf32> to vector<8x8xf32>
    %46 = vector.shape_cast %42 : vector<8x8xf32> to vector<1x8x8xf32>
    %47 = vector.shape_cast %43 : vector<8x8xf32> to vector<1x8x8xf32>
    %48 = vector.shape_cast %44 : vector<8x8xf32> to vector<1x8x8xf32>
    %49 = vector.shape_cast %45 : vector<8x8xf32> to vector<1x8x8xf32>
    %50 = tpu.concatenate %46, %47, %48, %49 in 0 : vector<1x8x8xf32>, vector<1x8x8xf32>, vector<1x8x8xf32>, vector<1x8x8xf32> -> vector<4x8x8xf32>
    %51 = arith.truncf %50 : vector<4x8x8xf32> to vector<4x8x8xbf16>
    %52 = vector.extract_strided_slice %31 {offsets = [0, 64], sizes = [8, 8], strides = [1, 1]} : vector<8x96xf32> to vector<8x8xf32>
    %53 = vector.extract_strided_slice %31 {offsets = [0, 72], sizes = [8, 8], strides = [1, 1]} : vector<8x96xf32> to vector<8x8xf32>
    %54 = vector.extract_strided_slice %31 {offsets = [0, 80], sizes = [8, 8], strides = [1, 1]} : vector<8x96xf32> to vector<8x8xf32>
    %55 = vector.extract_strided_slice %31 {offsets = [0, 88], sizes = [8, 8], strides = [1, 1]} : vector<8x96xf32> to vector<8x8xf32>
    %56 = vector.shape_cast %52 : vector<8x8xf32> to vector<1x8x8xf32>
    %57 = vector.shape_cast %53 : vector<8x8xf32> to vector<1x8x8xf32>
    %58 = vector.shape_cast %54 : vector<8x8xf32> to vector<1x8x8xf32>
    %59 = vector.shape_cast %55 : vector<8x8xf32> to vector<1x8x8xf32>
    %60 = tpu.concatenate %56, %57, %58, %59 in 0 : vector<1x8x8xf32>, vector<1x8x8xf32>, vector<1x8x8xf32>, vector<1x8x8xf32> -> vector<4x8x8xf32>
    %61 = arith.truncf %60 : vector<4x8x8xf32> to vector<4x8x8xbf16>
    %62 = tpu.iota {dimensions = array<i32: 0>} : vector<8x8xi32>
    %63 = tpu.iota {dimensions = array<i32: 1>} : vector<8x8xi32>
    %64 = arith.cmpi sle, %63, %62 : vector<8x8xi32>
    %65 = vector.broadcast %1 : i32 to vector<8x8xi32>
    %66 = arith.cmpi slt, %63, %65 : vector<8x8xi32>
    %67 = arith.andi %64, %66 : vector<8x8xi1>
    %cst_15 = arith.constant 0.000000e+00 : f32
    %cst_16 = arith.constant -1.000000e+09 : f32
    %68 = vector.broadcast %cst_15 : f32 to vector<8x8xf32>
    %69 = vector.broadcast %cst_16 : f32 to vector<8x8xf32>
    %70 = arith.select %67, %68, %69 : vector<8x8xi1>, vector<8x8xf32>
    "tpu.trace_start"() <{level = 10 : i32, message = "hqd,hkd->hqk"}> : () -> ()
    %cst_17 = arith.constant dense<0.000000e+00> : vector<4x8x8xf32>
    %71 = tpu.matmul %41, %51, %cst_17 {dimension_numbers = #tpu.dot_dimension_numbers<[2], [2], [1], [1], [0, 0, 0, 1, 1, 1], [0], [0]>} : vector<4x8x8xbf16>, vector<4x8x8xbf16>, vector<4x8x8xf32> -> vector<4x8x8xf32>
    "tpu.trace_stop"() : () -> ()
    %cst_18 = arith.constant 0.353553385 : f32
    %72 = vector.broadcast %cst_18 : f32 to vector<4x8x8xf32>
    %73 = arith.mulf %71, %72 : vector<4x8x8xf32>
    %74 = vector.shape_cast %70 : vector<8x8xf32> to vector<1x8x8xf32>
    %75 = vector.broadcast %74 : vector<1x8x8xf32> to vector<4x8x8xf32>
    %76 = arith.addf %73, %75 : vector<4x8x8xf32>
    %cst_19 = arith.constant dense<0xFF800000> : vector<4x8xf32>
    %77 = vector.multi_reduction <maximumf>, %76, %cst_19 [2] : vector<4x8x8xf32> to vector<4x8xf32>
    %78 = vector.shape_cast %77 : vector<4x8xf32> to vector<4x8x1xf32>
    %79 = vector.broadcast %78 : vector<4x8x1xf32> to vector<4x8x8xf32>
    %80 = arith.subf %76, %79 : vector<4x8x8xf32>
    %81 = math.exp %80 : vector<4x8x8xf32>
    %cst_20 = arith.constant dense<0.000000e+00> : vector<4x8xf32>
    %82 = vector.multi_reduction <add>, %81, %cst_20 [2] : vector<4x8x8xf32> to vector<4x8xf32>
    %83 = vector.shape_cast %82 : vector<4x8xf32> to vector<4x8x1xf32>
    %84 = tpu.reciprocal %83 {approx = true} : vector<4x8x1xf32> -> vector<4x8x1xf32>
    %85 = vector.broadcast %84 : vector<4x8x1xf32> to vector<4x8x8xf32>
    %86 = arith.mulf %81, %85 : vector<4x8x8xf32>
    %87 = arith.truncf %86 : vector<4x8x8xf32> to vector<4x8x8xbf16>
    "tpu.trace_start"() <{level = 10 : i32, message = "hqk,hkd->hqd"}> : () -> ()
    %cst_21 = arith.constant dense<0.000000e+00> : vector<4x8x8xf32>
    %88 = tpu.matmul %87, %61, %cst_21 {dimension_numbers = #tpu.dot_dimension_numbers<[2], [1], [1], [2], [0, 0, 0, 1, 1, 2], [0], [0]>} : vector<4x8x8xbf16>, vector<4x8x8xbf16>, vector<4x8x8xf32> -> vector<4x8x8xf32>
    "tpu.trace_stop"() : () -> ()
    %89 = vector.extract_strided_slice %88 {offsets = [0, 0, 0], sizes = [1, 8, 8], strides = [1, 1, 1]} : vector<4x8x8xf32> to vector<1x8x8xf32>
    %90 = vector.shape_cast %89 : vector<1x8x8xf32> to vector<8x8xf32>
    %91 = vector.extract_strided_slice %88 {offsets = [1, 0, 0], sizes = [1, 8, 8], strides = [1, 1, 1]} : vector<4x8x8xf32> to vector<1x8x8xf32>
    %92 = vector.shape_cast %91 : vector<1x8x8xf32> to vector<8x8xf32>
    %93 = vector.extract_strided_slice %88 {offsets = [2, 0, 0], sizes = [1, 8, 8], strides = [1, 1, 1]} : vector<4x8x8xf32> to vector<1x8x8xf32>
    %94 = vector.shape_cast %93 : vector<1x8x8xf32> to vector<8x8xf32>
    %95 = vector.extract_strided_slice %88 {offsets = [3, 0, 0], sizes = [1, 8, 8], strides = [1, 1, 1]} : vector<4x8x8xf32> to vector<1x8x8xf32>
    %96 = vector.shape_cast %95 : vector<1x8x8xf32> to vector<8x8xf32>
    %97 = tpu.concatenate %90, %92, %94, %96 in 1 : vector<8x8xf32>, vector<8x8xf32>, vector<8x8xf32>, vector<8x8xf32> -> vector<8x32xf32>
    %98 = arith.truncf %97 : vector<8x32xf32> to vector<8x32xbf16>
    %c0_22 = arith.constant 0 : index
    %c0_23 = arith.constant 0 : index
    %99 = vector.load %arg7[%c0_22, %c0_23] : memref<32x32xbf16, #tpu.memory_space<vmem>>, vector<32x32xbf16>
    %cst_24 = arith.constant dense<0.000000e+00> : vector<8x32xf32>
    %100 = tpu.matmul %98, %99, %cst_24 {dimension_numbers = #tpu.dot_dimension_numbers<[1], [0], [0], [1], [0, 0, 1, 1], [], []>} : vector<8x32xbf16>, vector<32x32xbf16>, vector<8x32xf32> -> vector<8x32xf32>
    %c0_25 = arith.constant 0 : index
    %c0_26 = arith.constant 0 : index
    %101 = vector.load %arg8[%c0_25, %c0_26] : memref<1x32xf32, #tpu.memory_space<vmem>>, vector<1x32xf32>
    %102 = vector.broadcast %101 : vector<1x32xf32> to vector<8x32xf32>
    %103 = arith.addf %100, %102 : vector<8x32xf32>
    %104 = arith.addf %3, %103 : vector<8x32xf32>
    %c0_27 = arith.constant 0 : index
    %c0_28 = arith.constant 0 : index
    %105 = vector.load %arg9[%c0_27, %c0_28] : memref<1x32xf32, #tpu.memory_space<vmem>>, vector<1x32xf32>
    %c0_29 = arith.constant 0 : index
    %c0_30 = arith.constant 0 : index
    %106 = vector.load %arg10[%c0_29, %c0_30] : memref<1x32xf32, #tpu.memory_space<vmem>>, vector<1x32xf32>
    %cst_31 = arith.constant dense<0.000000e+00> : vector<8xf32>
    %107 = vector.multi_reduction <add>, %104, %cst_31 [1] : vector<8x32xf32> to vector<8xf32>
    %108 = vector.shape_cast %107 : vector<8xf32> to vector<8x1xf32>
    %cst_32 = arith.constant 3.200000e+01 : f32
    %109 = vector.broadcast %cst_32 : f32 to vector<8x1xf32>
    %110 = arith.divf %108, %109 : vector<8x1xf32>
    %111 = vector.broadcast %110 : vector<8x1xf32> to vector<8x32xf32>
    %112 = arith.subf %104, %111 : vector<8x32xf32>
    %113 = arith.mulf %112, %112 : vector<8x32xf32>
    %cst_33 = arith.constant dense<0.000000e+00> : vector<8xf32>
    %114 = vector.multi_reduction <add>, %113, %cst_33 [1] : vector<8x32xf32> to vector<8xf32>
    %115 = vector.shape_cast %114 : vector<8xf32> to vector<8x1xf32>
    %cst_34 = arith.constant 3.200000e+01 : f32
    %116 = vector.broadcast %cst_34 : f32 to vector<8x1xf32>
    %117 = arith.divf %115, %116 : vector<8x1xf32>
    %cst_35 = arith.constant 9.99999974E-6 : f32
    %118 = vector.broadcast %cst_35 : f32 to vector<8x1xf32>
    %119 = arith.addf %117, %118 : vector<8x1xf32>
    %120 = math.rsqrt %119 : vector<8x1xf32>
    %121 = vector.broadcast %120 : vector<8x1xf32> to vector<8x32xf32>
    %122 = arith.mulf %112, %121 : vector<8x32xf32>
    %123 = vector.broadcast %105 : vector<1x32xf32> to vector<8x32xf32>
    %124 = arith.mulf %122, %123 : vector<8x32xf32>
    %125 = vector.broadcast %106 : vector<1x32xf32> to vector<8x32xf32>
    %126 = arith.addf %124, %125 : vector<8x32xf32>
    %127 = arith.truncf %126 : vector<8x32xf32> to vector<8x32xbf16>
    %c0_36 = arith.constant 0 : index
    %c0_37 = arith.constant 0 : index
    %128 = vector.load %arg11[%c0_36, %c0_37] : memref<32x128xbf16, #tpu.memory_space<vmem>>, vector<32x128xbf16>
    %cst_38 = arith.constant dense<0.000000e+00> : vector<8x128xf32>
    %129 = tpu.matmul %127, %128, %cst_38 {dimension_numbers = #tpu.dot_dimension_numbers<[1], [0], [0], [1], [0, 0, 1, 1], [], []>} : vector<8x32xbf16>, vector<32x128xbf16>, vector<8x128xf32> -> vector<8x128xf32>
    %c0_39 = arith.constant 0 : index
    %c0_40 = arith.constant 0 : index
    %130 = vector.load %arg12[%c0_39, %c0_40] : memref<1x128xf32, #tpu.memory_space<vmem>>, vector<1x128xf32>
    %131 = vector.broadcast %130 : vector<1x128xf32> to vector<8x128xf32>
    %132 = arith.addf %129, %131 : vector<8x128xf32>
    %133 = arith.mulf %132, %132 : vector<8x128xf32>
    %134 = arith.mulf %132, %133 : vector<8x128xf32>
    %cst_41 = arith.constant 4.471500e-02 : f32
    %135 = vector.broadcast %cst_41 : f32 to vector<8x128xf32>
    %136 = arith.mulf %135, %134 : vector<8x128xf32>
    %137 = arith.addf %132, %136 : vector<8x128xf32>
    %cst_42 = arith.constant 0.797884583 : f32
    %138 = vector.broadcast %cst_42 : f32 to vector<8x128xf32>
    %139 = arith.mulf %138, %137 : vector<8x128xf32>
    %140 = math.tanh %139 : vector<8x128xf32>
    %cst_43 = arith.constant 1.000000e+00 : f32
    %141 = vector.broadcast %cst_43 : f32 to vector<8x128xf32>
    %142 = arith.addf %141, %140 : vector<8x128xf32>
    %cst_44 = arith.constant 5.000000e-01 : f32
    %143 = vector.broadcast %cst_44 : f32 to vector<8x128xf32>
    %144 = arith.mulf %143, %142 : vector<8x128xf32>
    %145 = arith.mulf %132, %144 : vector<8x128xf32>
    %146 = arith.truncf %145 : vector<8x128xf32> to vector<8x128xbf16>
    %c0_45 = arith.constant 0 : index
    %c0_46 = arith.constant 0 : index
    %147 = vector.load %arg13[%c0_45, %c0_46] : memref<128x32xbf16, #tpu.memory_space<vmem>>, vector<128x32xbf16>
    %cst_47 = arith.constant dense<0.000000e+00> : vector<8x32xf32>
    %148 = tpu.matmul %146, %147, %cst_47 {dimension_numbers = #tpu.dot_dimension_numbers<[1], [0], [0], [1], [0, 0, 1, 1], [], []>} : vector<8x128xbf16>, vector<128x32xbf16>, vector<8x32xf32> -> vector<8x32xf32>
    %c0_48 = arith.constant 0 : index
    %c0_49 = arith.constant 0 : index
    %149 = vector.load %arg14[%c0_48, %c0_49] : memref<1x32xf32, #tpu.memory_space<vmem>>, vector<1x32xf32>
    %150 = vector.broadcast %149 : vector<1x32xf32> to vector<8x32xf32>
    %151 = arith.addf %148, %150 : vector<8x32xf32>
    %152 = arith.addf %104, %151 : vector<8x32xf32>
    %c0_50 = arith.constant 0 : index
    %c0_51 = arith.constant 0 : index
    %c0_52 = arith.constant 0 : index
    %153 = vector.load %arg15[%c0_50, %c0_51, %c0_52] : memref<1x8x32xf32, #tpu.memory_space<vmem>>, vector<1x8x32xf32>
    %154 = vector.shape_cast %153 : vector<1x8x32xf32> to vector<8x32xf32>
    %155 = vector.shape_cast %152 : vector<8x32xf32> to vector<1x8x32xf32>
    tpu.vector_store %arg15[%c0_50, %c0_51, %c0_52], %155 {strides = array<i32>} : memref<1x8x32xf32, #tpu.memory_space<vmem>>, vector<1x8x32xf32>,
    return
  }
  func.func @transform_0(%arg0: i32, %arg1: memref<2xi32, #tpu.memory_space<smem>>) -> (i32, i32, i32) {
    %c0_i32 = arith.constant 0 : i32
    %c0_i32_0 = arith.constant 0 : i32
    %c0_i32_1 = arith.constant 0 : i32
    return %arg0, %c0_i32, %c0_i32_0 : i32, i32, i32
  }
  func.func @transform_1(%arg0: i32, %arg1: memref<2xi32, #tpu.memory_space<smem>>) -> (i32, i32) {
    %c0_i32 = arith.constant 0 : i32
    %c0_i32_0 = arith.constant 0 : i32
    %c0_i32_1 = arith.constant 0 : i32
    return %c0_i32, %c0_i32_0 : i32, i32
  }
  func.func @transform_2(%arg0: i32, %arg1: memref<2xi32, #tpu.memory_space<smem>>) -> (i32, i32) {
    %c0_i32 = arith.constant 0 : i32
    %c0_i32_0 = arith.constant 0 : i32
    %c0_i32_1 = arith.constant 0 : i32
    return %c0_i32, %c0_i32_0 : i32, i32
  }
  func.func @transform_3(%arg0: i32, %arg1: memref<2xi32, #tpu.memory_space<smem>>) -> (i32, i32) {
    %c0_i32 = arith.constant 0 : i32
    %c0_i32_0 = arith.constant 0 : i32
    %c0_i32_1 = arith.constant 0 : i32
    return %c0_i32, %c0_i32_0 : i32, i32
  }
  func.func @transform_4(%arg0: i32, %arg1: memref<2xi32, #tpu.memory_space<smem>>) -> (i32, i32) {
    %c0_i32 = arith.constant 0 : i32
    %c0_i32_0 = arith.constant 0 : i32
    %c0_i32_1 = arith.constant 0 : i32
    return %c0_i32, %c0_i32_0 : i32, i32
  }
  func.func @transform_5(%arg0: i32, %arg1: memref<2xi32, #tpu.memory_space<smem>>) -> (i32, i32) {
    %c0_i32 = arith.constant 0 : i32
    %c0_i32_0 = arith.constant 0 : i32
    %c0_i32_1 = arith.constant 0 : i32
    return %c0_i32, %c0_i32_0 : i32, i32
  }
  func.func @transform_6(%arg0: i32, %arg1: memref<2xi32, #tpu.memory_space<smem>>) -> (i32, i32) {
    %c0_i32 = arith.constant 0 : i32
    %c0_i32_0 = arith.constant 0 : i32
    %c0_i32_1 = arith.constant 0 : i32
    return %c0_i32, %c0_i32_0 : i32, i32
  }
  func.func @transform_7(%arg0: i32, %arg1: memref<2xi32, #tpu.memory_space<smem>>) -> (i32, i32) {
    %c0_i32 = arith.constant 0 : i32
    %c0_i32_0 = arith.constant 0 : i32
    %c0_i32_1 = arith.constant 0 : i32
    return %c0_i32, %c0_i32_0 : i32, i32
  }
  func.func @transform_8(%arg0: i32, %arg1: memref<2xi32, #tpu.memory_space<smem>>) -> (i32, i32) {
    %c0_i32 = arith.constant 0 : i32
    %c0_i32_0 = arith.constant 0 : i32
    %c0_i32_1 = arith.constant 0 : i32
    return %c0_i32, %c0_i32_0 : i32, i32
  }
  func.func @transform_9(%arg0: i32, %arg1: memref<2xi32, #tpu.memory_space<smem>>) -> (i32, i32) {
    %c0_i32 = arith.constant 0 : i32
    %c0_i32_0 = arith.constant 0 : i32
    %c0_i32_1 = arith.constant 0 : i32
    return %c0_i32, %c0_i32_0 : i32, i32
  }
  func.func @transform_10(%arg0: i32, %arg1: memref<2xi32, #tpu.memory_space<smem>>) -> (i32, i32) {
    %c0_i32 = arith.constant 0 : i32
    %c0_i32_0 = arith.constant 0 : i32
    %c0_i32_1 = arith.constant 0 : i32
    return %c0_i32, %c0_i32_0 : i32, i32
  }
  func.func @transform_11(%arg0: i32, %arg1: memref<2xi32, #tpu.memory_space<smem>>) -> (i32, i32) {
    %c0_i32 = arith.constant 0 : i32
    %c0_i32_0 = arith.constant 0 : i32
    %c0_i32_1 = arith.constant 0 : i32
    return %c0_i32, %c0_i32_0 : i32, i32
  }
  func.func @transform_12(%arg0: i32, %arg1: memref<2xi32, #tpu.memory_space<smem>>) -> (i32, i32) {
    %c0_i32 = arith.constant 0 : i32
    %c0_i32_0 = arith.constant 0 : i32
    %c0_i32_1 = arith.constant 0 : i32
    return %c0_i32, %c0_i32_0 : i32, i32
  }
  func.func @transform_13(%arg0: i32, %arg1: memref<2xi32, #tpu.memory_space<smem>>) -> (i32, i32, i32) {
    %c0_i32 = arith.constant 0 : i32
    %c0_i32_0 = arith.constant 0 : i32
    %c0_i32_1 = arith.constant 0 : i32
    return %arg0, %c0_i32, %c0_i32_0 : i32, i32, i32
  }
}

module attributes {stable_mosaic.version = 11 : i64} {
  func.func @_final_ln_kernel(%arg0: memref<8x32xf32, #tpu.memory_space<vmem>>, %arg1: memref<1x32xf32, #tpu.memory_space<vmem>>, %arg2: memref<1x32xf32, #tpu.memory_space<vmem>>, %arg3: memref<8x32xbf16, #tpu.memory_space<vmem>>) attributes {dimension_semantics = [], scalar_prefetch = 0 : i64, scratch_operands = 0 : i64, tpu.core_type = #tpu.core_type<tc>} {
    %c0 = arith.constant 0 : index
    %c0_0 = arith.constant 0 : index
    %0 = vector.load %arg0[%c0, %c0_0] : memref<8x32xf32, #tpu.memory_space<vmem>>, vector<8x32xf32>
    %c0_1 = arith.constant 0 : index
    %c0_2 = arith.constant 0 : index
    %1 = vector.load %arg1[%c0_1, %c0_2] : memref<1x32xf32, #tpu.memory_space<vmem>>, vector<1x32xf32>
    %c0_3 = arith.constant 0 : index
    %c0_4 = arith.constant 0 : index
    %2 = vector.load %arg2[%c0_3, %c0_4] : memref<1x32xf32, #tpu.memory_space<vmem>>, vector<1x32xf32>
    %cst = arith.constant dense<0.000000e+00> : vector<8xf32>
    %3 = vector.multi_reduction <add>, %0, %cst [1] : vector<8x32xf32> to vector<8xf32>
    %4 = vector.shape_cast %3 : vector<8xf32> to vector<8x1xf32>
    %cst_5 = arith.constant 3.200000e+01 : f32
    %5 = vector.broadcast %cst_5 : f32 to vector<8x1xf32>
    %6 = arith.divf %4, %5 : vector<8x1xf32>
    %7 = vector.broadcast %6 : vector<8x1xf32> to vector<8x32xf32>
    %8 = arith.subf %0, %7 : vector<8x32xf32>
    %9 = arith.mulf %8, %8 : vector<8x32xf32>
    %cst_6 = arith.constant dense<0.000000e+00> : vector<8xf32>
    %10 = vector.multi_reduction <add>, %9, %cst_6 [1] : vector<8x32xf32> to vector<8xf32>
    %11 = vector.shape_cast %10 : vector<8xf32> to vector<8x1xf32>
    %cst_7 = arith.constant 3.200000e+01 : f32
    %12 = vector.broadcast %cst_7 : f32 to vector<8x1xf32>
    %13 = arith.divf %11, %12 : vector<8x1xf32>
    %cst_8 = arith.constant 9.99999974E-6 : f32
    %14 = vector.broadcast %cst_8 : f32 to vector<8x1xf32>
    %15 = arith.addf %13, %14 : vector<8x1xf32>
    %16 = math.rsqrt %15 : vector<8x1xf32>
    %17 = vector.broadcast %16 : vector<8x1xf32> to vector<8x32xf32>
    %18 = arith.mulf %8, %17 : vector<8x32xf32>
    %19 = vector.broadcast %1 : vector<1x32xf32> to vector<8x32xf32>
    %20 = arith.mulf %18, %19 : vector<8x32xf32>
    %21 = vector.broadcast %2 : vector<1x32xf32> to vector<8x32xf32>
    %22 = arith.addf %20, %21 : vector<8x32xf32>
    %23 = arith.truncf %22 : vector<8x32xf32> to vector<8x32xbf16>
    %c0_9 = arith.constant 0 : index
    %c0_10 = arith.constant 0 : index
    %24 = vector.load %arg3[%c0_9, %c0_10] : memref<8x32xbf16, #tpu.memory_space<vmem>>, vector<8x32xbf16>
    tpu.vector_store %arg3[%c0_9, %c0_10], %23 {strides = array<i32>} : memref<8x32xbf16, #tpu.memory_space<vmem>>, vector<8x32xbf16>,
    return
  }
}

module attributes {stable_mosaic.version = 11 : i64} {
  func.func @_lm_head_kernel(%arg0: i32, %arg1: memref<8x32xbf16, #tpu.memory_space<vmem>>, %arg2: memref<32x64xbf16, #tpu.memory_space<vmem>>, %arg3: memref<8x64xf32, #tpu.memory_space<vmem>>) attributes {dimension_semantics = [#tpu.dimension_semantics<parallel>], iteration_bounds = array<i64: 1>, scalar_prefetch = 0 : i64, scratch_operands = 0 : i64, tpu.core_type = #tpu.core_type<tc>, window_params = [{pipeline_mode = #tpu.pipeline_mode<synchronous>, transform_indices = @transform_0, window_bounds = array<i64: 8, 32>}, {transform_indices = @transform_1, window_bounds = array<i64: 32, 64>}, {transform_indices = @transform_2, window_bounds = array<i64: 8, 64>}]} {
    %c0 = arith.constant 0 : index
    %c0_0 = arith.constant 0 : index
    %0 = vector.load %arg1[%c0, %c0_0] : memref<8x32xbf16, #tpu.memory_space<vmem>>, vector<8x32xbf16>
    %c0_1 = arith.constant 0 : index
    %c0_2 = arith.constant 0 : index
    %1 = vector.load %arg2[%c0_1, %c0_2] : memref<32x64xbf16, #tpu.memory_space<vmem>>, vector<32x64xbf16>
    %cst = arith.constant dense<0.000000e+00> : vector<8x64xf32>
    %2 = tpu.matmul %0, %1, %cst {dimension_numbers = #tpu.dot_dimension_numbers<[1], [0], [0], [1], [0, 0, 1, 1], [], []>} : vector<8x32xbf16>, vector<32x64xbf16>, vector<8x64xf32> -> vector<8x64xf32>
    %c0_3 = arith.constant 0 : index
    %c0_4 = arith.constant 0 : index
    %3 = vector.load %arg3[%c0_3, %c0_4] : memref<8x64xf32, #tpu.memory_space<vmem>>, vector<8x64xf32>
    tpu.vector_store %arg3[%c0_3, %c0_4], %2 {strides = array<i32>} : memref<8x64xf32, #tpu.memory_space<vmem>>, vector<8x64xf32>,
    return
  }
  func.func @transform_0(%arg0: i32) -> (i32, i32) {
    %c0_i32 = arith.constant 0 : i32
    %c0_i32_0 = arith.constant 0 : i32
    %c0_i32_1 = arith.constant 0 : i32
    return %c0_i32, %c0_i32_0 : i32, i32
  }
  func.func @transform_1(%arg0: i32) -> (i32, i32) {
    %c0_i32 = arith.constant 0 : i32
    %c0_i32_0 = arith.constant 0 : i32
    return %c0_i32, %arg0 : i32, i32
  }
  func.func @transform_2(%arg0: i32) -> (i32, i32) {
    %c0_i32 = arith.constant 0 : i32
    %c0_i32_0 = arith.constant 0 : i32
    return %c0_i32, %arg0 : i32, i32
  }
}

</mosaic_0001>

<bundles_post_ra>
// kernel: _lambda_.6
= control target key start
LH: loop header
LB: loop body
LE: loop exit
PB: predicated region body
PF: predicated region fallthrough
CT: control target
= control target key end

     0   :  { %vm17_vm0 = vcmask 261120   ;;  %vm47_vm1 = vcmask 257024   ;;  %s89_s0 = inlined_call_operand.vmem [shape: f32[8,32], index: 0, kind: input, shape index: {}]   ;;  %s90_s1 = inlined_call_operand.vmem [shape: f32[1,32], index: 1, kind: input, shape index: {}]   ;;  %s91_s2 = inlined_call_operand.vmem [shape: f32[1,32], index: 2, kind: input, shape index: {}]   ;;  %s92_s3 = inlined_call_operand.vmem [shape: bf16[8,32], index: 3, kind: output, shape index: {}]  }
   0x1   :  { %v14_v0 = vld [vmem:[%s89_s0] sm:$0xff] }
   0x2   :  { %v18_v1 = vsel %vm17_vm0, %v14_v0, 0.0  ;;  %v53_v11 = vld [vmem:[%s90_s1] ss:$0 sm:$0xff] }
   0x3   :  { %19 = vadd.xlane.f32.xlu0 %v18_v1  ;;  %v54_v13 = vld [vmem:[%s91_s2] ss:$0 sm:$0xff] }
  0x8c   :  { %v20_v2 = vpop.xlane.xlu0 %19 }
  0x8d   :  { %v22_v3 = vmul.f32 0.03125, %v20_v2 }
  0x8f   :  { %v23_v4 = vsub.f32 %v14_v0, %v22_v3 }
  0x91   :  { %v24_v5 = vmul.f32 %v23_v4, %v23_v4 }
  0x93   :  { %v25_v6 = vsel %vm17_vm0, %v24_v5, 0.0 }
  0x94   :  { %26 = vadd.xlane.f32.xlu0 %v25_v6 }
 0x11d   :  { %v27_v7 = vpop.xlane.xlu0 %26 }
 0x11e   :  { %v28_v8 = vmul.f32 0.03125, %v27_v7 }
 0x120   :  { %v29_v9 = vadd.f32 1e-05, %v28_v8 }
 0x122   :  { %55 = vrsqrt.f32 %v29_v9 }
 0x12f   :  { %v56_v10 = vpop.eup %55 }
 0x130   :  { %v31_v12 = vmul.f32 %v56_v10, %v23_v4 }
 0x132   :  { %v38_v14 = vmul.f32 %v53_v11, %v31_v12 }
 0x134   :  { %v45_v15 = vadd.f32 %v54_v13, %v38_v14 }
 0x136   :  { %v46_v16 = vpack.c.bf16 %v45_v15, %v45_v15 }
 0x138   :  { %48 = vst.msk [vmem:[%s92_s3] sm:$0xf] %vm47_vm1, %v46_v16 }

// kernel: _lambda_.7
= control target key start
LH: loop header
LB: loop body
LE: loop exit
PB: predicated region body
PF: predicated region fallthrough
CT: control target
= control target key end

     0   :  { %v97_v0 = vmov 0.0   ;;  %vm98_vm0 = vmmov 0   ;;  %vm29_vm1 = vcmask 261120   ;;  %vm73_vm2 = vcmask 523264   ;;  %s126_s1 = inlined_call_operand.vmem [shape: bf16[32,64], index: 1, kind: input, shape index: {}]   ;;  %s127_s0 = inlined_call_operand.vmem [shape: bf16[8,32], index: 0, kind: input, shape index: {}]   ;;  %s128_s2 = inlined_call_operand.vmem [shape: f32[8,64], index: 2, kind: output, shape index: {}]  }
   0x1   :  { %85 = vmatprep.subr.bf16.mxu0 %v97_v0  ;;  %v95_v1 = vld [vmem:[%s126_s1 + $0x8] sm:$0xff]   ;;  %89 = vmatprep.mubr.msk.bf16.mxu0 %vm98_vm0, %v97_v0  ;;  %v96_v2 = vld [vmem:[%s126_s1] sm:$0xff]  }
   0x2   :  { %86 = vmatpush3.bf16.msra.mxu0 %v95_v1  ;;  %v12_v3 = vld [vmem:[%s127_s0] sm:$0xf] }
   0x3   :  { %87 = vmatprep.subr.bf16.mxu0 %v97_v0 }
   0x6   :  { %88 = vmatpush3.bf16.msra.mxu0 %v96_v2 }
   0x9   :  { %90 = vmatmul.mubr.msk.bf16.vlgmr.msra.gmra.mxu0 %vm29_vm1, %v12_v3 }
  0xc9   :  { %v67_v4 = vpop.f32.mrf.mxu0 }
  0xca   :  { %74 = vst.msk [vmem:[%s128_s2] sm:$0xff] %vm73_vm2, %v67_v4 }
  0xcb   :  { %v91_v5 = vpop.f32.mrf.mxu0 }
  0xcd   :  { %v70_v6 = vpop.f32.mrf.mxu0 }
  0xcf   :  { %v92_v7 = vpop.f32.mrf.mxu0 }

// kernel: _lambda_.4
= control target key start
LH: loop header
LB: loop body
LE: loop exit
PB: predicated region body
PF: predicated region fallthrough
CT: control target
= control target key end

     0   :  { %s1914_s0 = inlined_call_operand.vmem [shape: s32[2], index: 0, kind: input, shape index: {}]   ;;  %s1915_s1 = inlined_call_operand.vmem [shape: f32[2,8,32], index: 1, kind: input, shape index: {}]   ;;  %s1916_s2 = inlined_call_operand.vmem [shape: f32[1,32], index: 2, kind: input, shape index: {}]   ;;  %s1917_s3 = inlined_call_operand.vmem [shape: f32[1,32], index: 3, kind: input, shape index: {}]   ;;  %s1918_s4 = inlined_call_operand.vmem [shape: bf16[32,96], index: 4, kind: input, shape index: {}]   ;;  %s1919_s5 = inlined_call_operand.vmem [shape: f32[1,96], index: 5, kind: input, shape index: {}]   ;;  %s1920_s6 = inlined_call_operand.vmem [shape: bf16[32,32], index: 6, kind: input, shape index: {}]   ;;  %s1921_s7 = inlined_call_operand.vmem [shape: f32[1,32], index: 7, kind: input, shape index: {}]   ;;  %s1922_s8 = inlined_call_operand.vmem [shape: f32[1,32], index: 8, kind: input, shape index: {}]   ;;  %s1923_s9 = inlined_call_operand.vmem [shape: f32[1,32], index: 9, kind: input, shape index: {}]   ;;  %s1924_s10 = inlined_call_operand.vmem [shape: bf16[32,128], index: 10, kind: input, shape index: {}]   ;;  %s1925_s11 = inlined_call_operand.vmem [shape: f32[1,128], index: 11, kind: input, shape index: {}]   ;;  %s1926_s12 = inlined_call_operand.vmem [shape: bf16[128,32], index: 12, kind: input, shape index: {}]   ;;  %s1927_s13 = inlined_call_operand.vmem [shape: f32[1,32], index: 13, kind: input, shape index: {}]   ;;  %s1928_s14 = inlined_call_operand.vmem [shape: f32[2,8,32], index: 14, kind: output, shape index: {}]  }
   0x1   :  { %s19_s15 = sshll.u32 %s1914_s0, 4  ;;  %s20_s15 = int_to_ptr.vmem [resolvable:$true] %s19_s15 }
   0x2   :  { %s1594_s16 = scalar_lea.vmem %s20_s15, 16  ;;  %p1599_p1 = scmp.lt.s32.totalorder %s20_s15, %s20_s15 }
   0x3   :  { %p1595_p0 = scmp.ne.s32.totalorder %s20_s15, %s1594_s16  ;;  %p1600_p2 = scmp.lt.s32.totalorder %s1594_s16, %s1594_s16 }
   0x5   :  { %p1601_p3 = por %p1600_p2, %p1599_p1 }
   0x7   :  { %p1602_p4 = pnand %p1601_p3, %p1595_p0 }
   0x9   :  { %1605 = shalt.err (!%p1602_p4)  }
   0xa   :  { %s1616_s17 = smov [#allocation3]  }
   0xb   :  { %22 = dma.vmem_to_smem %s20_s15, 16, %s1616_s17, [#allocation2] }
   0xc   :  { %1610 = dma.done.wait [#allocation2], 16 }
   0xd   :  { %1611 = vsyncadd [#allocation2], 4294967280 }
   0xe   :  { %24 = sfence }
   0xf   :  { %s1706_s18 = smov 0  }
  0x10 LB: > { %s1712_s0 = sadd.s32 4294967295, %s1614_s18   ;;  %p1374_p5 = scmp.ge.s32.totalorder %s1614_s18, 1  ;;  %s1614_s18 = sphi %s1706_s18, %s30_s18  }
  0x11   : > { %p393_p6 = scmp.lt.s32.totalorder %s1614_s18, 3 }
  0x13   : > { %p394_p7 = pnand %p1374_p5, %p393_p6 }
  0x14   : > { %p435_p8 = scmp.lt.s32.totalorder (!%p394_p7), %s1712_s0, 1  ;;  %s1619_s21 = smov (!%p394_p7), 104  }
  0x15   : > { %397 = sbr.rel (%p394_p7) target bundleno = 2539 (0x9eb), region = 72  ;;  %s1620_s22 = smov (!%p394_p7), 120  }
  0x16   : > { %s1622_s24 = smov (!%p394_p7), 96   ;;  %s444_s25 = sld [smem:[#allocation3 + %s1712_s0]] (!%p394_p7) }
  0x17   : > { %s1625_s30 = smov (!%p394_p7), 8   ;;  %s1626_s15 = smov (!%p394_p7), 16  }
  0x18   : > { %s1627_s16 = smov (!%p394_p7), 24  }
  0x1a   : > { %s1718_s19 = scalar_select %p435_p8, %s1712_s0, 1  ;;  %vm448_vm0 = vcmask 261120   ;;  %v1558_v7 = vld [vmem:[%s1918_s4 + $0x8] sm:$0xff]   ;;  %v1617_v8 = vmov 0.0   ;;  %vm1618_vm1 = vmmov 0   ;;  %v1559_v9 = vld [vmem:[%s1918_s4] sm:$0xff]   ;;  %v558_v41 = vlaneseq }
  0x1b   : > { %1446 = vmatprep.subr.bf16.mxu0 %v1617_v8  ;;  %1450 = vmatprep.mubr.msk.bf16.mxu0 %vm1618_vm1, %v1617_v8  ;;  %v1377_v14 = vld [vmem:[%s1916_s2] ss:$0 sm:$0xff]  ;;  %vm570_vm2 = vcmask 64512   ;;  %v1623_v46 = vmov -1e+09   ;;  %s1624_s0 = smov 64  }
  0x1c   : > { %s1375_s20 = sshll.u32 %s1718_s19, 3  ;;  %1447 = vmatpush3.bf16.msra.mxu0 %v1558_v7  ;;  %1466 = vmatprep.subr.bf16.mxu1 %v1617_v8  ;;  %v1378_v16 = vld [vmem:[%s1917_s3] ss:$0 sm:$0xff]  ;;  %v559_v42 = vshrl.u32 %v558_v41, 7  ;;  %v561_v43 = vand.u32 127, %v558_v41  ;;  %v563_v44 = vstv %s444_s25  ;;  %vm825_vm6 = vcmask 1043456  }
  0x1d   : > { %s438_s23 = scalar_lea.vmem %s1915_s1, %s1375_s20  ;;  %1448 = vmatprep.subr.bf16.mxu0 %v1617_v8  ;;  %1468 = vmatprep.mubr.msk.bf16.mxu1 %vm1618_vm1, %v1617_v8  ;;  %v1379_v20 = vld [vmem:[%s1919_s5] ss:$0 sm:$0xff]  ;;  %vm1026_vm7 = vcmask 130048   ;;  %vm1028_vm8 = vcmask 195584  }
  0x1e   : > { %v1726_v0 = vld [vmem:[%s438_s23] sm:$0xff]  ;;  %s1621_s23 = smov 112   ;;  %vm562_vm3 = vcmp.le.s32.totalorder %v561_v43, %v559_v42  ;;  %vm564_vm4 = vcmp.lt.s32.totalorder %v561_v43, %v563_v44 }
  0x1f   : > { %v449_v1 = vsel %vm448_vm0, %v1726_v0, 0.0  ;;  %vm565_vm5 = vmand %vm562_vm3, %vm564_vm4 }
  0x20   : > { %450 = vadd.xlane.f32.xlu0 %v449_v1  ;;  %1449 = vmatpush3.bf16.msra.mxu0 %v1559_v9  ;;  %v566_v47 = vsel %vm565_vm5, 0.0, %v1623_v46 }
  0x21   : > { %1454 = vmatprep.subr.bf16.mxu0 %v1617_v8 }
  0xa9   : > { %v451_v2 = vpop.xlane.xlu0 %450 }
  0xaa   : > { %v453_v3 = vmul.f32 0.03125, %v451_v2 }
  0xac   : > { %v454_v4 = vsub.f32 %v1726_v0, %v453_v3 }
  0xae   : > { %v455_v5 = vmul.f32 %v454_v4, %v454_v4 }
  0xb0   : > { %v456_v6 = vsel %vm448_vm0, %v455_v5, 0.0 }
  0xb1   : > { %457 = vadd.xlane.f32.xlu0 %v456_v6 }
 0x13a   : > { %v458_v10 = vpop.xlane.xlu0 %457 }
 0x13b   : > { %v459_v11 = vmul.f32 0.03125, %v458_v10 }
 0x13d   : > { %v460_v12 = vadd.f32 1e-05, %v459_v11 }
 0x13f   : > { %1572 = vrsqrt.f32 %v460_v12 }
 0x14c   : > { %v1573_v13 = vpop.eup %1572 }
 0x14d   : > { %v462_v15 = vmul.f32 %v1573_v13, %v454_v4 }
 0x14f   : > { %v469_v17 = vmul.f32 %v1377_v14, %v462_v15 }
 0x151   : > { %v476_v18 = vadd.f32 %v1378_v16, %v469_v17 }
 0x153   : > { %v477_v19 = vpack.c.bf16 %v476_v18, %v476_v18 }
 0x155   : > { %1451 = vmatmul.mubr.msk.bf16.vlgmr.msra.gmra.mxu0 %vm448_vm0, %v477_v19 }
 0x156   : > { %1456 = vmatprep.mubr.msk.bf16.mxu0 %vm1618_vm1, %v1617_v8 }
 0x215   : > { %v538_v21 = vpop.f32.mrf.mxu0 }
 0x216   : > { %v539_v22 = vadd.f32 %v1379_v20, %v538_v21 }
 0x217   : > { %v1452_v23 = vpop.f32.mrf.mxu0 }
 0x218   : > { %551 = vrot.lane.b32.xlu0 %v539_v22, %s1619_s21  ;;  %545 = vrot.lane.b32.xlu1 %v539_v22, %s1620_s22  ;;  %v1758_v26 = vpack.c.bf16 %v539_v22, %v539_v22 }
 0x219   : > { %v541_v24 = vpop.f32.mrf.mxu0 }
 0x21b   : > { %v1453_v25 = vpop.f32.mrf.mxu0 }
 0x21c   : > { %548 = vrot.lane.b32.xlu1 %v539_v22, %s1621_s23 }
 0x220   : > { %568 = vrot.lane.b32.xlu1 %v1758_v26, %s1622_s24 }
 0x28a   : > { %v546_v27 = vpop.permute.xlu1 %545  ;;  %v552_v31 = vpop.permute.xlu0 %551 }
 0x28b   : > { %v1761_v28 = vpack.c.bf16 %v546_v27, %v546_v27  ;;  %v1767_v33 = vpack.c.bf16 %v552_v31, %v552_v31 }
 0x28d   : > { %618 = vrot.lane.b32.xlu1 %v1761_v28, %s1622_s24 }
 0x28e   : > { %v549_v29 = vpop.permute.xlu1 %548 }
 0x28f   : > { %v1764_v30 = vpack.c.bf16 %v549_v29, %v549_v29 }
 0x291   : > { %667 = vrot.lane.b32.xlu1 %v1764_v30, %s1622_s24 }
 0x292   : > { %v569_v32 = vpop.permute.xlu1 %568 }
 0x293   : > { %v575_v34 = vsel %vm570_vm2, %v569_v32, 0 }
 0x294   : > { %1455 = vmatpush3.bf16.xpose.msra.mxu0 %v575_v34 }
 0x295   : > { %716 = vrot.lane.b32.xlu1 %v1767_v33, %s1622_s24  ;;  %1460 = vmatprep.subr.bf16.mxu0 %v1617_v8  ;;  %s442_s24 = scalar_lea.vmem %s1928_s14, %s1375_s20 }
 0x29b   : > { %1457 = vmatmul.mubr.msk.bf16.vlgmr.msra.gmra.mxu0 %vm570_vm2, %v1758_v26 }
 0x29c   : > { %1462 = vmatprep.mubr.msk.bf16.mxu0 %vm1618_vm1, %v1617_v8 }
 0x2ff   : > { %v619_v35 = vpop.permute.xlu1 %618 }
 0x300   : > { %v624_v36 = vsel %vm570_vm2, %v619_v35, 0 }
 0x301   : > { %1461 = vmatpush3.bf16.xpose.msra.mxu0 %v624_v36 }
 0x302   : > { %1472 = vmatprep.subr.bf16.mxu0 %v1617_v8 }
 0x303   : > { %v668_v37 = vpop.permute.xlu1 %667 }
 0x304   : > { %v673_v38 = vsel %vm570_vm2, %v668_v37, 0 }
 0x305   : > { %1467 = vmatpush3.bf16.xpose.msra.mxu1 %v673_v38 }
 0x306   : > { %1478 = vmatprep.subr.bf16.mxu1 %v1617_v8 }
 0x307   : > { %v717_v39 = vpop.permute.xlu1 %716 }
 0x308   : > { %v722_v40 = vsel %vm570_vm2, %v717_v39, 0  ;;  %1463 = vmatmul.mubr.msk.bf16.vlgmr.msra.gmra.mxu0 %vm570_vm2, %v1761_v28 }
 0x309   : > { %1473 = vmatpush3.bf16.xpose.msra.mxu0 %v722_v40  ;;  %1474 = vmatprep.mubr.msk.bf16.mxu0 %vm1618_vm1, %v1617_v8 }
 0x30a   : > { %1484 = vmatprep.subr.bf16.mxu0 %v1617_v8 }
 0x30c   : > { %1469 = vmatmul.mubr.msk.bf16.vlgmr.msra.gmra.mxu1 %vm570_vm2, %v1764_v30 }
 0x30d   : > { %1480 = vmatprep.mubr.msk.bf16.mxu1 %vm1618_vm1, %v1617_v8 }
 0x310   : > { %1475 = vmatmul.mubr.msk.bf16.vlgmr.msra.gmra.mxu0 %vm570_vm2, %v1767_v33 }
 0x311   : > { %1486 = vmatprep.mubr.msk.bf16.mxu0 %vm1618_vm1, %v1617_v8 }
 0x35b   : > { %v611_v45 = vpop.f32.mrf.mxu0 }
 0x35c   : > { %v764_v48 = vmul.f32 0.35355338, %v611_v45 }
 0x35d   : > { %v1458_v49 = vpop.f32.mrf.mxu0 }
 0x35e   : > { %v768_v50 = vadd.f32 %v764_v48, %v566_v47 }
 0x35f   : > { %v614_v51 = vpop.f32.mrf.mxu0 }
 0x360   : > { %v772_v52 = vsel %vm570_vm2, %v768_v50, -inf }
 0x361   : > { %773 = vmax.xlane.f32.xlu1 %v772_v52  ;;  %v1459_v53 = vpop.f32.mrf.mxu0 }
 0x3c8   : > { %v660_v54 = vpop.f32.mrf.mxu0 }
 0x3c9   : > { %v765_v55 = vmul.f32 0.35355338, %v660_v54 }
 0x3ca   : > { %v1464_v56 = vpop.f32.mrf.mxu0 }
 0x3cb   : > { %v769_v57 = vadd.f32 %v765_v55, %v566_v47 }
 0x3cc   : > { %v663_v58 = vpop.f32.mrf.mxu0  ;;  %v709_v59 = vpop.f32.mrf.mxu1 }
 0x3cd   : > { %v766_v60 = vmul.f32 0.35355338, %v709_v59  ;;  %v775_v61 = vsel %vm570_vm2, %v769_v57, -inf }
 0x3ce   : > { %v1470_v62 = vpop.f32.mrf.mxu1  ;;  %776 = vmax.xlane.f32.xlu0 %v775_v61  ;;  %v1465_v63 = vpop.f32.mrf.mxu0  ;;  %v1560_v61 = vld [vmem:[%s1920_s6 + $0x8] sm:$0xff]  }
 0x3cf   : > { %v770_v1 = vadd.f32 %v766_v60, %v566_v47  ;;  %v1561_v62 = vld [vmem:[%s1920_s6] sm:$0xff]  }
 0x3d0   : > { %v712_v2 = vpop.f32.mrf.mxu1  ;;  %v758_v3 = vpop.f32.mrf.mxu0 }
 0x3d1   : > { %v767_v4 = vmul.f32 0.35355338, %v758_v3  ;;  %v778_v5 = vsel %vm570_vm2, %v770_v1, -inf }
 0x3d2   : > { %v1471_v6 = vpop.f32.mrf.mxu1  ;;  %779 = vmax.xlane.f32.xlu1 %v778_v5  ;;  %v1476_v7 = vpop.f32.mrf.mxu0 }
 0x3d3   : > { %v771_v9 = vadd.f32 %v767_v4, %v566_v47 }
 0x3d4   : > { %v761_v10 = vpop.f32.mrf.mxu0 }
 0x3d5   : > { %v781_v11 = vsel %vm570_vm2, %v771_v9, -inf }
 0x3d6   : > { %782 = vmax.xlane.f32.xlu0 %v781_v11  ;;  %v1477_v12 = vpop.f32.mrf.mxu0 }
 0x3e3   : > { %820 = vrot.lane.b32.xlu1 %v1758_v26, %s1624_s0 }
 0x3ea   : > { %v774_v13 = vpop.xlane.xlu1 %773 }
 0x3eb   : > { %v784_v14 = vsub.f32 %v768_v50, %v774_v13 }
 0x3ed   : > { %v788_v15 = vmul.f32 1.442695, %v784_v14 }
 0x3ef   : > { %1574 = vpow2.f32 %v788_v15 }
 0x3fc   : > { %v1575_v16 = vpop.eup %1574 }
 0x3fd   : > { %v796_v17 = vsel %vm570_vm2, %v1575_v16, 0.0 }
 0x407   : > { %797 = vadd.xlane.f32.xlu1 %v796_v17 }
 0x457   : > { %v777_v18 = vpop.xlane.xlu0 %776 }
 0x458   : > { %v785_v19 = vsub.f32 %v769_v57, %v777_v18 }
 0x45a   : > { %v790_v20 = vmul.f32 1.442695, %v785_v19 }
 0x45b   : > { %v780_v21 = vpop.xlane.xlu1 %779 }
 0x45c   : > { %1576 = vpow2.f32 %v790_v20  ;;  %v786_v22 = vsub.f32 %v770_v1, %v780_v21  ;;  %v1391_v20 = vld [vmem:[%s1921_s7] ss:$0 sm:$0xff] }
 0x45e   : > { %v792_v23 = vmul.f32 1.442695, %v786_v22 }
 0x45f   : > { %v821_v24 = vpop.permute.xlu1 %820  ;;  %v783_v25 = vpop.xlane.xlu0 %782 }
 0x460   : > { %1578 = vpow2.f32 %v792_v23  ;;  %v827_v26 = vsel %vm825_vm6, %v821_v24, 0  ;;  %v787_v27 = vsub.f32 %v771_v9, %v783_v25 }
 0x461   : > { %1479 = vmatpush3.bf16.msra.mxu1 %v827_v26 }
 0x462   : > { %v794_v29 = vmul.f32 1.442695, %v787_v27  ;;  %1490 = vmatprep.subr.bf16.mxu1 %v1617_v8 }
 0x464   : > { %1580 = vpow2.f32 %v794_v29 }
 0x469   : > { %v1577_v31 = vpop.eup %1576 }
 0x46a   : > { %v799_v32 = vsel %vm570_vm2, %v1577_v31, 0.0 }
 0x46b   : > { %800 = vadd.xlane.f32.xlu0 %v799_v32 }
 0x46d   : > { %v1579_v34 = vpop.eup %1578 }
 0x46e   : > { %v802_v35 = vsel %vm570_vm2, %v1579_v34, 0.0 }
 0x46f   : > { %803 = vadd.xlane.f32.xlu1 %v802_v35 }
 0x471   : > { %v1581_v36 = vpop.eup %1580 }
 0x472   : > { %v805_v37 = vsel %vm570_vm2, %v1581_v36, 0.0 }
 0x473   : > { %806 = vadd.xlane.f32.xlu0 %v805_v37 }
 0x480   : > { %917 = vrot.lane.b32.xlu1 %v1764_v30, %s1624_s0 }
 0x484   : > { %965 = vrot.lane.b32.xlu1 %v1767_v33, %s1624_s0 }
 0x489   : > { %869 = vrot.lane.b32.xlu0 %v1761_v28, %s1624_s0 }
 0x490   : > { %v798_v38 = vpop.xlane.xlu1 %797 }
 0x491   : > { %1582 = vrcp.f32 %v798_v38 }
 0x49e   : > { %v1583_v39 = vpop.eup %1582 }
 0x49f   : > { %v812_v40 = vmul.f32 %v1583_v39, %v1575_v16 }
 0x4a1   : > { %v816_v41 = vpack.c.bf16 %v812_v40, %v812_v40 }
 0x4a3   : > { %1481 = vmatmul.mubr.msk.bf16.vlgmr.msra.gmra.mxu1 %vm570_vm2, %v816_v41  ;;  %v1395_v41 = vld [vmem:[%s1922_s8] ss:$0 sm:$0xff] }
 0x4a4   : > { %1492 = vmatprep.mubr.msk.bf16.mxu1 %vm1618_vm1, %v1617_v8 }
 0x4f4   : > { %v801_v42 = vpop.xlane.xlu0 %800 }
 0x4f5   : > { %1584 = vrcp.f32 %v801_v42 }
 0x4f8   : > { %v804_v43 = vpop.xlane.xlu1 %803 }
 0x4f9   : > { %1586 = vrcp.f32 %v804_v43  ;;  %v1396_v43 = vld [vmem:[%s1923_s9] ss:$0 sm:$0xff] }
 0x4fc   : > { %v918_v30 = vpop.permute.xlu1 %917  ;;  %v807_v44 = vpop.xlane.xlu0 %806 }
 0x4fd   : > { %v923_v33 = vsel %vm825_vm6, %v918_v30, 0  ;;  %1588 = vrcp.f32 %v807_v44 }
 0x4fe   : > { %1491 = vmatpush3.bf16.msra.mxu1 %v923_v33 }
 0x4ff   : > { %1502 = vmatprep.subr.bf16.mxu1 %v1617_v8 }
 0x500   : > { %v870_v28 = vpop.permute.xlu0 %869  ;;  %v966_v48 = vpop.permute.xlu1 %965 }
 0x501   : > { %v875_v45 = vsel %vm825_vm6, %v870_v28, 0  ;;  %v971_v51 = vsel %vm825_vm6, %v966_v48, 0  ;;  %v1564_v28 = vld [vmem:[%s1926_s12 + $0x38] sm:$0xff]  }
 0x502   : > { %v1585_v46 = vpop.eup %1584  ;;  %1485 = vmatpush3.bf16.msra.mxu0 %v875_v45  ;;  %v1565_v45 = vld [vmem:[%s1926_s12 + $0x30] sm:$0xff]   ;;  %v1568_v48 = vld [vmem:[%s1926_s12 + $0x18] sm:$0xff]  }
 0x503   : > { %1496 = vmatprep.subr.bf16.mxu0 %v1617_v8  ;;  %v813_v47 = vmul.f32 %v1585_v46, %v1577_v31  ;;  %v1566_v46 = vld [vmem:[%s1926_s12 + $0x28] sm:$0xff]  }
 0x505   : > { %v817_v49 = vpack.c.bf16 %v813_v47, %v813_v47  ;;  %v1567_v47 = vld [vmem:[%s1926_s12 + $0x20] sm:$0xff]  }
 0x506   : > { %v1587_v50 = vpop.eup %1586 }
 0x507   : > { %1487 = vmatmul.mubr.msk.bf16.vlgmr.msra.gmra.mxu0 %vm570_vm2, %v817_v49  ;;  %v814_v52 = vmul.f32 %v1587_v50, %v1579_v34  ;;  %v1569_v49 = vld [vmem:[%s1926_s12 + $0x10] sm:$0xff]   ;;  %v1570_v50 = vld [vmem:[%s1926_s12 + $0x8] sm:$0xff]  }
 0x508   : > { %1497 = vmatpush3.bf16.msra.mxu0 %v971_v51  ;;  %1498 = vmatprep.mubr.msk.bf16.mxu0 %vm1618_vm1, %v1617_v8  ;;  %v1571_v51 = vld [vmem:[%s1926_s12] sm:$0xff]  }
 0x509   : > { %v818_v53 = vpack.c.bf16 %v814_v52, %v814_v52  ;;  %1510 = vmatprep.subr.bf16.mxu0 %v1617_v8  ;;  %v1397_v52 = vld [vmem:[%s1925_s11] ss:$0 sm:$0xff] }
 0x50a   : > { %v1589_v54 = vpop.eup %1588 }
 0x50b   : > { %1493 = vmatmul.mubr.msk.bf16.vlgmr.msra.gmra.mxu1 %vm570_vm2, %v818_v53  ;;  %v815_v55 = vmul.f32 %v1589_v54, %v1581_v36  ;;  %v1562_v36 = vld [vmem:[%s1924_s10 + $0x8] sm:$0xff]  }
 0x50c   : > { %1506 = vmatprep.mubr.msk.bf16.mxu1 %vm1618_vm1, %v1617_v8  ;;  %1503 = vmatpush3.bf16.msra.mxu1 %v1560_v61 }
 0x50d   : > { %v819_v56 = vpack.c.bf16 %v815_v55, %v815_v55  ;;  %1504 = vmatprep.subr.bf16.mxu1 %v1617_v8 }
 0x50f   : > { %1499 = vmatmul.mubr.msk.bf16.vlgmr.msra.gmra.mxu0 %vm570_vm2, %v819_v56 }
 0x510   : > { %1514 = vmatprep.mubr.msk.bf16.mxu0 %vm1618_vm1, %v1617_v8  ;;  %1505 = vmatpush3.bf16.msra.mxu1 %v1561_v62 }
 0x511   : > { %1518 = vmatprep.subr.bf16.mxu1 %v1617_v8  ;;  %1511 = vmatpush3.bf16.msra.mxu0 %v1562_v36 }
 0x512   : > { %1512 = vmatprep.subr.bf16.mxu0 %v1617_v8 }
 0x563   : > { %v863_v57 = vpop.f32.mrf.mxu1 }
 0x565   : > { %v1482_v58 = vpop.f32.mrf.mxu1 }
 0x567   : > { %v866_v59 = vpop.f32.mrf.mxu1 }
 0x569   : > { %v1483_v60 = vpop.f32.mrf.mxu1 }
 0x5c7   : > { %v911_v63 = vpop.f32.mrf.mxu0 }
 0x5c8   : > { %1014 = vrot.lane.b32.xlu0 %v911_v63, %s1625_s30 }
 0x5c9   : > { %v1488_v1 = vpop.f32.mrf.mxu0 }
 0x5cb   : > { %v914_v2 = vpop.f32.mrf.mxu0  ;;  %v959_v3 = vpop.f32.mrf.mxu1 }
 0x5cc   : > { %1018 = vrot.lane.b32.xlu1 %v959_v3, %s1626_s15 }
 0x5cd   : > { %v1489_v4 = vpop.f32.mrf.mxu0  ;;  %v1494_v5 = vpop.f32.mrf.mxu1 }
 0x5ce   : > { %v1401_v4 = vld [vmem:[%s1927_s13] ss:$0 sm:$0xff] }
 0x5cf   : > { %v962_v6 = vpop.f32.mrf.mxu1  ;;  %v1007_v7 = vpop.f32.mrf.mxu0 }
 0x5d0   : > { %1022 = vrot.lane.b32.xlu0 %v1007_v7, %s1627_s16 }
 0x5d1   : > { %v1495_v9 = vpop.f32.mrf.mxu1  ;;  %v1500_v10 = vpop.f32.mrf.mxu0 }
 0x5d3   : > { %v1010_v11 = vpop.f32.mrf.mxu0 }
 0x5d5   : > { %v1501_v12 = vpop.f32.mrf.mxu0 }
 0x63a   : > { %v1015_v13 = vpop.permute.xlu0 %1014 }
 0x63b   : > { %v1025_v15 = vsel %vm570_vm2, %v863_v57, %v1015_v13 }
 0x63e   : > { %v1019_v14 = vpop.permute.xlu1 %1018 }
 0x63f   : > { %v1027_v16 = vsel %vm1026_vm7, %v1025_v15, %v1019_v14 }
 0x642   : > { %v1023_v17 = vpop.permute.xlu0 %1022 }
 0x643   : > { %v1029_v18 = vsel %vm1028_vm8, %v1027_v16, %v1023_v17 }
 0x644   : > { %v1030_v19 = vpack.c.bf16 %v1029_v18, %v1029_v18 }
 0x646   : > { %1507 = vmatmul.mubr.msk.bf16.vlgmr.msra.gmra.mxu1 %vm448_vm0, %v1030_v19 }
 0x647   : > { %1534 = vmatprep.mubr.msk.bf16.mxu1 %vm1618_vm1, %v1617_v8  ;;  %1519 = vmatpush3.bf16.msra.mxu1 %v1564_v28 }
 0x648   : > { %1520 = vmatprep.subr.bf16.mxu1 %v1617_v8 }
 0x64b   : > { %1521 = vmatpush3.bf16.msra.mxu1 %v1565_v45 }
 0x64c   : > { %1522 = vmatprep.subr.bf16.mxu1 %v1617_v8 }
 0x64f   : > { %1523 = vmatpush3.bf16.msra.mxu1 %v1566_v46 }
 0x650   : > { %1524 = vmatprep.subr.bf16.mxu1 %v1617_v8 }
 0x653   : > { %1525 = vmatpush3.bf16.msra.mxu1 %v1567_v47 }
 0x654   : > { %1526 = vmatprep.subr.bf16.mxu1 %v1617_v8 }
 0x657   : > { %1527 = vmatpush3.bf16.msra.mxu1 %v1568_v48 }
 0x658   : > { %1528 = vmatprep.subr.bf16.mxu1 %v1617_v8 }
 0x65b   : > { %1529 = vmatpush3.bf16.msra.mxu1 %v1569_v49 }
 0x65c   : > { %1530 = vmatprep.subr.bf16.mxu1 %v1617_v8 }
 0x65f   : > { %1531 = vmatpush3.bf16.msra.mxu1 %v1570_v50 }
 0x660   : > { %1532 = vmatprep.subr.bf16.mxu1 %v1617_v8 }
 0x663   : > { %1533 = vmatpush3.bf16.msra.mxu1 %v1571_v51 }
 0x706   : > { %v1091_v21 = vpop.f32.mrf.mxu1 }
 0x707   : > { %v1092_v22 = vadd.f32 %v1391_v20, %v1091_v21 }
 0x708   : > { %v1508_v23 = vpop.f32.mrf.mxu1 }
 0x709   : > { %v1847_v24 = vadd.f32 %v1092_v22, %v1726_v0  ;;  %v1563_v0 = vld [vmem:[%s1924_s10] sm:$0xff]  }
 0x70a   : > { %v1094_v25 = vpop.f32.mrf.mxu1  ;;  %1513 = vmatpush3.bf16.msra.mxu0 %v1563_v0 }
 0x70b   : > { %v1100_v26 = vsel %vm448_vm0, %v1847_v24, 0.0 }
 0x70c   : > { %1101 = vadd.xlane.f32.xlu1 %v1100_v26  ;;  %v1509_v27 = vpop.f32.mrf.mxu1 }
 0x795   : > { %v1102_v29 = vpop.xlane.xlu1 %1101 }
 0x796   : > { %v1103_v31 = vmul.f32 0.03125, %v1102_v29 }
 0x798   : > { %v1104_v32 = vsub.f32 %v1847_v24, %v1103_v31 }
 0x79a   : > { %v1105_v34 = vmul.f32 %v1104_v32, %v1104_v32 }
 0x79c   : > { %v1106_v35 = vsel %vm448_vm0, %v1105_v34, 0.0 }
 0x79d   : > { %1107 = vadd.xlane.f32.xlu0 %v1106_v35 }
 0x826   : > { %v1108_v37 = vpop.xlane.xlu0 %1107 }
 0x827   : > { %v1109_v38 = vmul.f32 0.03125, %v1108_v37 }
 0x829   : > { %v1110_v39 = vadd.f32 1e-05, %v1109_v38 }
 0x82b   : > { %1590 = vrsqrt.f32 %v1110_v39 }
 0x838   : > { %v1591_v40 = vpop.eup %1590 }
 0x839   : > { %v1112_v42 = vmul.f32 %v1591_v40, %v1104_v32 }
 0x83b   : > { %v1119_v30 = vmul.f32 %v1395_v41, %v1112_v42 }
 0x83d   : > { %v1126_v44 = vadd.f32 %v1396_v43, %v1119_v30 }
 0x83f   : > { %v1127_v33 = vpack.c.bf16 %v1126_v44, %v1126_v44 }
 0x841   : > { %1515 = vmatmul.mubr.msk.bf16.vlgmr.msra.gmra.mxu0 %vm448_vm0, %v1127_v33 }
 0x901   : > { %v1188_v53 = vpop.f32.mrf.mxu0 }
 0x902   : > { %v1189_v54 = vadd.f32 %v1397_v52, %v1188_v53 }
 0x903   : > { %v1516_v55 = vpop.f32.mrf.mxu0 }
 0x904   : > { %v1194_v56 = vmul.f32 %v1189_v54, %v1189_v54 }
 0x905   : > { %v1191_v57 = vpop.f32.mrf.mxu0 }
 0x906   : > { %v1195_v58 = vmul.f32 %v1194_v56, %v1189_v54 }
 0x907   : > { %v1517_v59 = vpop.f32.mrf.mxu0 }
 0x908   : > { %v1196_v60 = vmul.f32 0.044715, %v1195_v58 }
 0x90a   : > { %v1197_v61 = vadd.f32 %v1196_v60, %v1189_v54 }
 0x90c   : > { %v1198_v62 = vmul.f32 0.7978846, %v1197_v61 }
 0x90e   : > { %1592 = vtanh.f32 %v1198_v62 }
 0x91b   : > { %v1593_v63 = vpop.eup %1592 }
 0x91c   : > { %v1200_v1 = vadd.f32 1.0, %v1593_v63 }
 0x91e   : > { %v1201_v8 = vmul.f32 0.5, %v1200_v1 }
 0x920   : > { %v1202_v2 = vmul.f32 %v1201_v8, %v1189_v54 }
 0x922   : > { %v1203_v3 = vpack.c.bf16 %v1202_v2, %v1202_v2 }
 0x924   : > { %1535 = vmatmul.mubr.bf16.vlgmr.msra.gmra.mxu1 %v1203_v3 }
 0x9e4   : > { %v1309_v5 = vpop.f32.mrf.mxu1 }
 0x9e5   : > { %v1310_v6 = vadd.f32 %v1401_v4, %v1309_v5 }
 0x9e6   : > { %v1536_v7 = vpop.f32.mrf.mxu1 }
 0x9e7   : > { %v1315_v9 = vadd.f32 %v1310_v6, %v1847_v24 }
 0x9e8   : > { %v1312_v10 = vpop.f32.mrf.mxu1 }
 0x9e9   : > { %1316 = vst.msk [vmem:[%s442_s24] sm:$0xff] %vm448_vm0, %v1315_v9 }
 0x9ea   : > { %v1537_v11 = vpop.f32.mrf.mxu1 }
 0x9eb PF: > { %s30_s18 = sadd.s32 1, %s1614_s18  }
 0x9ec   : > { %p27_p9 = scmp.ge.s32.totalorder %s30_s18, 4  }
 0x9ee   :  { %29 = sbr.rel (!%p27_p9) target bundleno = 16 (0x10), region = 102 }

</bundles_post_ra>
